<compile_context>
chip_gen: v7x
topology: tpu7x:2x2x1
jax: 0.10.0
libtpu: 0.0.40
codegen_flags: <defaults>
</compile_context>

<pallas_src>
import numpy as np
import jax
import jax.numpy as jnp
from jax.experimental import pallas as pl
from jax.experimental.pallas import tpu as pltpu

# ----- CnnClassifier hyper-parameters (module defaults) ---------------------
VOCAB_SIZE = 64
EMBED = 50                      # vocab_embed_size
FILTER_SIZES = (2, 3, 4, 5)     # sorted filter_sizes
OUT_DIM = 300
NUM_CLASSES = 2
PAD_INDEX = 2
NUM_FILTERS = OUT_DIM // len(FILTER_SIZES)   # 75 per conv
MAX_W = max(FILTER_SIZES)
K_IM2COL = MAX_W * EMBED                     # 250


def _round_up(x, m):
    return (x + m - 1) // m * m


# ----- Pallas kernel: fused conv-matmul + masked max-pool + bias/ReLU + FC --
def make_kernel(P):
    """P = bucketed number of conv positions (multiple of 8)."""

    def kernel(slab_ref, wconv_ref, npos_ref, bconv_ref, fcw_ref, fcb_ref, out_ref):
        slab = slab_ref[...]                                   # (TB*P, 250)

        # One big MXU matmul covers every filter / tap / position.
        scores = jnp.dot(slab, wconv_ref[...],
                         preferred_element_type=jnp.float32)   # (TB*P, 300) f32
        tb = scores.shape[0] // P
        scores = scores.reshape(tb, P, OUT_DIM)

        # Mask positions invalid for each filter width, then max over positions
        # (== AdaptiveMaxPool1d(1)).
        pos = jax.lax.broadcasted_iota(jnp.int32, (P, OUT_DIM), 0)
        valid = pos < npos_ref[...]                            # (P, 300)
        masked = jnp.where(valid[None, :, :], scores, jnp.float32(-1e30))
        pooled = jnp.max(masked, axis=1)                       # (TB, 300)

        # Bias + ReLU hoisted out of the pooling loop.
        pooled = jnp.maximum(pooled + bconv_ref[...], 0.0)

        # Single fused FC: (TB,300) x (300,2).
        logits = jnp.dot(pooled.astype(fcw_ref.dtype), fcw_ref[...],
                         preferred_element_type=jnp.float32) + fcb_ref[...]
        out_ref[...] = logits.astype(out_ref.dtype)

    return kernel


# ----- One-time parameter preprocessing (hoisted out of the call path) ------
def prepare_params(params, compute_dtype=jnp.float32):
    """Concatenate / zero-pad conv weights into one (250, 300) matrix, etc."""
    w_all = jnp.zeros((K_IM2COL, OUT_DIM), jnp.float32)
    b_all = []
    for i, w in enumerate(FILTER_SIZES):
        cw = params[f"conv{w}_w"]                              # (F, E, w) torch layout
        cwt = jnp.transpose(cw, (2, 1, 0)).reshape(w * EMBED, NUM_FILTERS)
        w_all = w_all.at[:w * EMBED, i * NUM_FILTERS:(i + 1) * NUM_FILTERS].set(cwt)
        b_all.append(params[f"conv{w}_b"])
    return {
        "embedding": params["embedding"].astype(jnp.float32),
        "w_conv": w_all.astype(compute_dtype),                          # (250, 300)
        "b_conv": jnp.concatenate(b_all).reshape(1, OUT_DIM).astype(jnp.float32),
        "fc_wt": params["fc_w"].T.astype(compute_dtype),                # (300, 2)
        "fc_b": params["fc_b"].reshape(1, NUM_CLASSES).astype(jnp.float32),
        "compute_dtype": compute_dtype,
    }


# ----- Wrapper: embedding / view glue + im2col + pallas_call -----------------
def cnn_forward(x_idx, prep, real_len=None):
    compute_dtype = prep["compute_dtype"]
    if real_len is None:
        # NOTE: mirrors torch's `dim=0` reduction exactly (per-position counts).
        real_len = jnp.sum(x_idx != PAD_INDEX, axis=0)

    emb = prep["embedding"][x_idx]                 # (B, T, E); embedding_dropout = identity
    B, T, E = emb.shape
    if T < MAX_W:
        emb = jnp.concatenate([emb, jnp.zeros((B, MAX_W - T, E), emb.dtype)], axis=1)
        T = MAX_W

    # L is data-dependent in PyTorch and feeds a raw `.view(-1, E, L)` memory
    # reinterpretation, so it must be concrete here (host sync).
    # TODO(synk): if upstream ever replaces the raw view with a transpose, L can
    # stay on-device and only the static bucket P below matters.
    L = int(max(int(jnp.max(real_len)), MAX_W))
    emb = emb[:, :L, :]

    # Replicate torch's `.contiguous().view(-1, E, L)` (raw reinterpretation,
    # NOT a transpose), then move channels to the lane axis for the kernel.
    xv = jnp.reshape(emb, (-1, E, L))              # (B, E, L)
    xk = jnp.transpose(xv, (0, 2, 1))              # (B, L, C=E)

    # Bucket positions to a multiple of 8: kernel compiles per bucket, not per L.
    P = max(_round_up(L, 8), 8)
    xk = jnp.pad(xk, ((0, 0), (0, P + MAX_W - 1 - L), (0, 0)))

    # im2col slab: slab[b*P + p, k*E + c] = xk[b, p + k, c]
    # TODO(synk): at large B*L this 5x duplication could be built in-kernel from
    # the raw (B, L, C) input to cut HBM traffic.
    slab = jnp.concatenate([xk[:, k:k + P, :] for k in range(MAX_W)], axis=-1)
    slab = slab.reshape(B * P, K_IM2COL).astype(compute_dtype)

    # Valid conv positions per output column (filter i valid iff p < L - w_i + 1).
    npos = jnp.repeat(
        jnp.array([L - w + 1 for w in FILTER_SIZES], jnp.int32), NUM_FILTERS
    ).reshape(1, OUT_DIM)

    # Batch tiling: one grid step per TB batch rows, marked "parallel".
    TB = B if B <= 8 else 8
    B_pad = _round_up(B, TB)
    if B_pad != B:
        slab = jnp.pad(slab, ((0, (B_pad - B) * P), (0, 0)))

    out = pl.pallas_call(
        make_kernel(P),
        out_shape=jax.ShapeDtypeStruct((B_pad, NUM_CLASSES), jnp.float32),
        grid=(B_pad // TB,),
        in_specs=[
            pl.BlockSpec((TB * P, K_IM2COL), lambda i: (i, 0)),     # activations
            pl.BlockSpec((K_IM2COL, OUT_DIM), lambda i: (0, 0)),    # fused conv W
            pl.BlockSpec((1, OUT_DIM), lambda i: (0, 0)),           # valid-position counts
            pl.BlockSpec((1, OUT_DIM), lambda i: (0, 0)),           # conv biases
            pl.BlockSpec((OUT_DIM, NUM_CLASSES), lambda i: (0, 0)),  # fc weight
            pl.BlockSpec((1, NUM_CLASSES), lambda i: (0, 0)),       # fc bias
        ],
        out_specs=pl.BlockSpec((TB, NUM_CLASSES), lambda i: (i, 0)),
        compiler_params=pltpu.CompilerParams(
            dimension_semantics=("parallel",)),
    )(slab, prep["w_conv"], npos, prep["b_conv"], prep["fc_wt"], prep["fc_b"])

    return out[:B]                                  # fc_dropout = identity


# ----- Pure-JAX reference (mirrors the PyTorch forward exactly) -------------
def reference(x_idx, params, real_len=None):
    if real_len is None:
        real_len = jnp.sum(x_idx != PAD_INDEX, axis=0)
    emb = params["embedding"][x_idx]
    B, T, E = emb.shape
    maxw = max(FILTER_SIZES)
    if T < maxw:
        emb = jnp.concatenate(
            [emb, jnp.zeros((B, maxw - T, E), emb.dtype)], axis=1)
    L = int(max(int(jnp.max(real_len)), maxw))
    emb = emb[:, :L, :]
    xv = jnp.reshape(emb, (-1, E, L))
    outs = []
    for wsize in FILTER_SIZES:
        W = params[f"conv{wsize}_w"]
        b = params[f"conv{wsize}_b"]
        pos = []
        for p in range(L - wsize + 1):
            win = xv[:, :, p:p + wsize]              # (B, C, wsize)
            pos.append(jnp.einsum("bck,fck->bf", win, W) + b)
        co = jnp.maximum(jnp.stack(pos, axis=-1), 0.0)
        outs.append(jnp.max(co, axis=-1))
    hidden = jnp.concatenate(outs, axis=-1)
    return hidden @ params["fc_w"].T + params["fc_b"]


if __name__ == "__main__":
    key = jax.random.PRNGKey(0)
    keys = jax.random.split(key, 4 + 2 * len(FILTER_SIZES))
    k_x, k_emb, k_fc, k_fcb = keys[:4]
    k_conv = keys[4:]

    # Deterministic synthetic parameters (module zero-fills; use randoms so the
    # kernel does non-trivial work; keep padding_idx row at zero).
    params = {}
    emb_tbl = 0.1 * jax.random.normal(k_emb, (VOCAB_SIZE, EMBED), jnp.float32)
    params["embedding"] = emb_tbl.at[PAD_INDEX].set(0.0)
    for i, wsize in enumerate(FILTER_SIZES):
        params[f"conv{wsize}_w"] = 0.1 * jax.random.normal(
            k_conv[2 * i], (NUM_FILTERS, EMBED, wsize), jnp.float32)
        params[f"conv{wsize}_b"] = 0.1 * jax.random.normal(
            k_conv[2 * i + 1], (NUM_FILTERS,), jnp.float32)
    params["fc_w"] = 0.1 * jax.random.normal(k_fc, (NUM_CLASSES, OUT_DIM), jnp.float32)
    params["fc_b"] = 0.1 * jax.random.normal(k_fcb, (NUM_CLASSES,), jnp.float32)

    # input: token indices, (batch=2, seq=16)
    x = jax.random.randint(k_x, (2, 16), 0, VOCAB_SIZE, dtype=jnp.int32)

    ref = reference(x, params)

    # f32 operand path (exact-match, all generations).
    prep32 = prepare_params(params, jnp.float32)
    out32 = jax.block_until_ready(cnn_forward(x, prep32))
    np.testing.assert_allclose(np.asarray(out32), np.asarray(ref),
                               rtol=1e-4, atol=1e-4)

    # bf16 matmul operands with f32 accumulation (v6e/v7x MXU throughput path).
    prep16 = prepare_params(params, jnp.bfloat16)
    out16 = jax.block_until_ready(cnn_forward(x, prep16))
    np.testing.assert_allclose(np.asarray(out16), np.asarray(ref),
                               rtol=3e-2, atol=3e-2)

    print("KERNEL_OK")
</pallas_src>

<mosaic_0001>
module attributes {stable_mosaic.version = 11 : i64} {
  func.func @kernel(%arg0: i32, %arg1: memref<16x250xf32, #tpu.memory_space<vmem>>, %arg2: memref<250x300xf32, #tpu.memory_space<vmem>>, %arg3: memref<1x300xi32, #tpu.memory_space<vmem>>, %arg4: memref<1x300xf32, #tpu.memory_space<vmem>>, %arg5: memref<300x2xf32, #tpu.memory_space<vmem>>, %arg6: memref<1x2xf32, #tpu.memory_space<vmem>>, %arg7: memref<2x2xf32, #tpu.memory_space<vmem>>) attributes {dimension_semantics = [#tpu.dimension_semantics<parallel>], iteration_bounds = array<i64: 1>, scalar_prefetch = 0 : i64, scratch_operands = 0 : i64, tpu.core_type = #tpu.core_type<tc>, window_params = [{transform_indices = @transform_0, window_bounds = array<i64: 16, 250>}, {pipeline_mode = #tpu.pipeline_mode<synchronous>, transform_indices = @transform_1, window_bounds = array<i64: 250, 300>}, {pipeline_mode = #tpu.pipeline_mode<synchronous>, transform_indices = @transform_2, window_bounds = array<i64: 1, 300>}, {pipeline_mode = #tpu.pipeline_mode<synchronous>, transform_indices = @transform_3, window_bounds = array<i64: 1, 300>}, {pipeline_mode = #tpu.pipeline_mode<synchronous>, transform_indices = @transform_4, window_bounds = array<i64: 300, 2>}, {pipeline_mode = #tpu.pipeline_mode<synchronous>, transform_indices = @transform_5, window_bounds = array<i64: 1, 2>}, {transform_indices = @transform_6, window_bounds = array<i64: 2, 2>}]} {
    %c0 = arith.constant 0 : index
    %c0_0 = arith.constant 0 : index
    %0 = vector.load %arg1[%c0, %c0_0] : memref<16x250xf32, #tpu.memory_space<vmem>>, vector<16x250xf32>
    %c0_1 = arith.constant 0 : index
    %c0_2 = arith.constant 0 : index
    %1 = vector.load %arg2[%c0_1, %c0_2] : memref<250x300xf32, #tpu.memory_space<vmem>>, vector<250x300xf32>
    %cst = arith.constant dense<0.000000e+00> : vector<16x300xf32>
    %2 = tpu.matmul %0, %1, %cst {dimension_numbers = #tpu.dot_dimension_numbers<[1], [0], [0], [1], [0, 0, 1, 1], [], []>} : vector<16x250xf32>, vector<250x300xf32>, vector<16x300xf32> -> vector<16x300xf32>
    %3 = vector.shape_cast %2 : vector<16x300xf32> to vector<2x8x300xf32>
    %4 = tpu.iota {dimensions = array<i32: 0>} : vector<8x300xi32>
    %c0_3 = arith.constant 0 : index
    %c0_4 = arith.constant 0 : index
    %5 = vector.load %arg3[%c0_3, %c0_4] : memref<1x300xi32, #tpu.memory_space<vmem>>, vector<1x300xi32>
    %6 = vector.broadcast %5 : vector<1x300xi32> to vector<8x300xi32>
    %7 = arith.cmpi slt, %4, %6 : vector<8x300xi32>
    %8 = vector.shape_cast %7 : vector<8x300xi1> to vector<1x8x300xi1>
    %cst_5 = arith.constant -1.000000e+30 : f32
    %9 = vector.shape_cast %8 : vector<1x8x300xi1> to vector<1x8x300xi1>
    %10 = vector.broadcast %9 : vector<1x8x300xi1> to vector<2x8x300xi1>
    %11 = vector.broadcast %cst_5 : f32 to vector<2x8x300xf32>
    %12 = arith.select %10, %3, %11 : vector<2x8x300xi1>, vector<2x8x300xf32>
    %cst_6 = arith.constant dense<0xFF800000> : vector<2x300xf32>
    %13 = vector.multi_reduction <maximumf>, %12, %cst_6 [1] : vector<2x8x300xf32> to vector<2x300xf32>
    %c0_7 = arith.constant 0 : index
    %c0_8 = arith.constant 0 : index
    %14 = vector.load %arg4[%c0_7, %c0_8] : memref<1x300xf32, #tpu.memory_space<vmem>>, vector<1x300xf32>
    %15 = vector.broadcast %14 : vector<1x300xf32> to vector<2x300xf32>
    %16 = arith.addf %13, %15 : vector<2x300xf32>
    %cst_9 = arith.constant 0.000000e+00 : f32
    %17 = vector.broadcast %cst_9 : f32 to vector<2x300xf32>
    %18 = arith.maximumf %16, %17 : vector<2x300xf32>
    %c0_10 = arith.constant 0 : index
    %c0_11 = arith.constant 0 : index
    %19 = vector.load %arg5[%c0_10, %c0_11] : memref<300x2xf32, #tpu.memory_space<vmem>>, vector<300x2xf32>
    %cst_12 = arith.constant dense<0.000000e+00> : vector<2x2xf32>
    %20 = tpu.matmul %18, %19, %cst_12 {dimension_numbers = #tpu.dot_dimension_numbers<[1], [0], [0], [1], [0, 0, 1, 1], [], []>} : vector<2x300xf32>, vector<300x2xf32>, vector<2x2xf32> -> vector<2x2xf32>
    %c0_13 = arith.constant 0 : index
    %c0_14 = arith.constant 0 : index
    %21 = vector.load %arg6[%c0_13, %c0_14] : memref<1x2xf32, #tpu.memory_space<vmem>>, vector<1x2xf32>
    %22 = vector.broadcast %21 : vector<1x2xf32> to vector<2x2xf32>
    %23 = arith.addf %20, %22 : vector<2x2xf32>
    %c0_15 = arith.constant 0 : index
    %c0_16 = arith.constant 0 : index
    %24 = vector.load %arg7[%c0_15, %c0_16] : memref<2x2xf32, #tpu.memory_space<vmem>>, vector<2x2xf32>
    tpu.vector_store %arg7[%c0_15, %c0_16], %23 {strides = array<i32>} : memref<2x2xf32, #tpu.memory_space<vmem>>, vector<2x2xf32>,
    return
  }
  func.func @transform_0(%arg0: i32) -> (i32, i32) {
    %c0_i32 = arith.constant 0 : i32
    %c0_i32_0 = arith.constant 0 : i32
    return %arg0, %c0_i32 : i32, i32
  }
  func.func @transform_1(%arg0: i32) -> (i32, i32) {
    %c0_i32 = arith.constant 0 : i32
    %c0_i32_0 = arith.constant 0 : i32
    %c0_i32_1 = arith.constant 0 : i32
    return %c0_i32, %c0_i32_0 : i32, i32
  }
  func.func @transform_2(%arg0: i32) -> (i32, i32) {
    %c0_i32 = arith.constant 0 : i32
    %c0_i32_0 = arith.constant 0 : i32
    %c0_i32_1 = arith.constant 0 : i32
    return %c0_i32, %c0_i32_0 : i32, i32
  }
  func.func @transform_3(%arg0: i32) -> (i32, i32) {
    %c0_i32 = arith.constant 0 : i32
    %c0_i32_0 = arith.constant 0 : i32
    %c0_i32_1 = arith.constant 0 : i32
    return %c0_i32, %c0_i32_0 : i32, i32
  }
  func.func @transform_4(%arg0: i32) -> (i32, i32) {
    %c0_i32 = arith.constant 0 : i32
    %c0_i32_0 = arith.constant 0 : i32
    %c0_i32_1 = arith.constant 0 : i32
    return %c0_i32, %c0_i32_0 : i32, i32
  }
  func.func @transform_5(%arg0: i32) -> (i32, i32) {
    %c0_i32 = arith.constant 0 : i32
    %c0_i32_0 = arith.constant 0 : i32
    %c0_i32_1 = arith.constant 0 : i32
    return %c0_i32, %c0_i32_0 : i32, i32
  }
  func.func @transform_6(%arg0: i32) -> (i32, i32) {
    %c0_i32 = arith.constant 0 : i32
    %c0_i32_0 = arith.constant 0 : i32
    return %arg0, %c0_i32 : i32, i32
  }
}

</mosaic_0001>

<bundles_post_ra>
// kernel: tpu_custom_call.1
= control target key start
LH: loop header
LB: loop body
LE: loop exit
PB: predicated region body
PF: predicated region fallthrough
CT: control target
= control target key end

     0   :  { %vm124_vm0 = vcmask 998400   ;;  %vm131_vm1 = vcmask 1041408   ;;  %vm888_vm2 = vmmov 1   ;;  %s1401_s0 = inlined_call_operand.vmem [shape: f32[16,250], index: 0, kind: input, shape index: {}]   ;;  %s1402_s1 = inlined_call_operand.vmem [shape: f32[250,300], index: 1, kind: input, shape index: {}]   ;;  %s1403_s2 = inlined_call_operand.vmem [shape: s32[1,300], index: 2, kind: input, shape index: {}]   ;;  %s1404_s3 = inlined_call_operand.vmem [shape: f32[1,300], index: 3, kind: input, shape index: {}]   ;;  %s1405_s4 = inlined_call_operand.vmem [shape: f32[300,2], index: 4, kind: input, shape index: {}]   ;;  %s1406_s5 = inlined_call_operand.vmem [shape: f32[1,2], index: 5, kind: input, shape index: {}]   ;;  %s1407_s6 = inlined_call_operand.hbm [shape: f32[2,2], index: 6, kind: output, shape index: {}]  }
   0x1   :  { %v29_v0 = vld [vmem:[%s1402_s1 + $0x8] sm:$0xff]  ;;  %v32_v1 = vld [vmem:[%s1402_s1 + $0x20] sm:$0xff]  ;;  %v31_v4 = vld [vmem:[%s1402_s1 + $0x18] sm:$0xff] }
   0x2   :  { %v28_v2 = vld [vmem:[%s1402_s1] sm:$0xff]  ;;  %v718_v3 = vpack.c.bf16 %v32_v1, %v29_v0  ;;  %v35_v5 = vld [vmem:[%s1402_s1 + $0x38] sm:$0xff]  ;;  %v38_v6 = vld [vmem:[%s1402_s1 + $0x50] sm:$0xff] }
   0x3   :  { %v720_v7 = vpack.c.bf16 %v31_v4, %v28_v2  ;;  %v722_v8 = vpack.c.bf16 %v38_v6, %v35_v5  ;;  %v34_v9 = vld [vmem:[%s1402_s1 + $0x30] sm:$0xff]  ;;  %v37_v10 = vld [vmem:[%s1402_s1 + $0x48] sm:$0xff]  ;;  %v44_v12 = vld [vmem:[%s1402_s1 + $0x80] sm:$0xff] }
   0x4   :  { %v41_v11 = vld [vmem:[%s1402_s1 + $0x68] sm:$0xff]  ;;  %719 = vmatprep.subr.bf16.mxu0 %v718_v3  ;;  %v724_v13 = vpack.c.bf16 %v37_v10, %v34_v9  ;;  %v40_v15 = vld [vmem:[%s1402_s1 + $0x60] sm:$0xff]  ;;  %v43_v16 = vld [vmem:[%s1402_s1 + $0x78] sm:$0xff] }
   0x5   :  { %721 = vmatpush1.bf16.msra.mxu0 %v720_v7  ;;  %v726_v14 = vpack.c.bf16 %v44_v12, %v41_v11  ;;  %v47_v17 = vld [vmem:[%s1402_s1 + $0x98] sm:$0xff]  ;;  %v50_v18 = vld [vmem:[%s1402_s1 + $0xb0] sm:$0xff]  ;;  %v728_v19 = vpack.c.bf16 %v43_v16, %v40_v15  ;;  %v81_v21 = vld [vmem:[%s1402_s1 + $0x1a8] sm:$0xff] }
   0x6   :  { %723 = vmatprep.subr.bf16.mxu0 %v722_v8  ;;  %v78_v20 = vld [vmem:[%s1402_s1 + $0x190] sm:$0xff]  ;;  %v730_v23 = vpack.c.bf16 %v50_v18, %v47_v17  ;;  %v49_v25 = vld [vmem:[%s1402_s1 + $0xa8] sm:$0xff]  ;;  %v56_v29 = vld [vmem:[%s1402_s1 + $0xe0] sm:$0xff] }
   0x7   :  { %v30_v22 = vld [vmem:[%s1402_s1 + $0x10] sm:$0xff]  ;;  %v784_v26 = vpack.c.bf16 %v81_v21, %v78_v20  ;;  %v33_v27 = vld [vmem:[%s1402_s1 + $0x28] sm:$0xff]  ;;  %v84_v31 = vld [vmem:[%s1402_s1 + $0x1c0] sm:$0xff] }
   0x8   :  { %v46_v24 = vld [vmem:[%s1402_s1 + $0x90] sm:$0xff]  ;;  %v53_v28 = vld [vmem:[%s1402_s1 + $0xc8] sm:$0xff]  ;;  %v786_v30 = vpack.c.bf16 %v33_v27, %v30_v22  ;;  %v87_v32 = vld [vmem:[%s1402_s1 + $0x1d8] sm:$0xff] }
   0x9   :  { %725 = vmatpush1.bf16.msra.mxu0 %v724_v13  ;;  %785 = vmatprep.subr.bf16.mxu1 %v784_v26  ;;  %v36_v33 = vld [vmem:[%s1402_s1 + $0x40] sm:$0xff]  ;;  %v39_v34 = vld [vmem:[%s1402_s1 + $0x58] sm:$0xff]  ;;  %v732_v35 = vpack.c.bf16 %v49_v25, %v46_v24  ;;  %v788_v38 = vpack.c.bf16 %v87_v32, %v84_v31  ;;  %v734_v40 = vpack.c.bf16 %v56_v29, %v53_v28  ;;  %v90_v42 = vld [vmem:[%s1402_s1 + $0x1f0] sm:$0xff] }
   0xa   :  { %727 = vmatprep.subr.bf16.mxu0 %v726_v14  ;;  %v52_v36 = vld [vmem:[%s1402_s1 + $0xc0] sm:$0xff]  ;;  %v55_v37 = vld [vmem:[%s1402_s1 + $0xd8] sm:$0xff]  ;;  %787 = vmatpush3.bf16.msra.mxu1 %v786_v30  ;;  %v790_v39 = vpack.c.bf16 %v39_v34, %v36_v33  ;;  %v93_v43 = vld [vmem:[%s1402_s1 + $0x208] sm:$0xff] }
   0xb   :  { %v59_v41 = vld [vmem:[%s1402_s1 + $0xf8] sm:$0xff]  ;;  %v62_v44 = vld [vmem:[%s1402_s1 + $0x110] sm:$0xff]  ;;  %789 = vmatprep.subr.bf16.mxu1 %v788_v38  ;;  %v792_v45 = vpack.c.bf16 %v93_v43, %v90_v42  ;;  %v45_v47 = vld [vmem:[%s1402_s1 + $0x88] sm:$0xff]  ;;  %v736_v48 = vpack.c.bf16 %v55_v37, %v52_v36 }
   0xc   :  { %v42_v46 = vld [vmem:[%s1402_s1 + $0x70] sm:$0xff]  ;;  %v96_v51 = vld [vmem:[%s1402_s1 + $0x220] sm:$0xff]  ;;  %v99_v52 = vld [vmem:[%s1402_s1 + $0x238] sm:$0xff]  ;;  %v738_v53 = vpack.c.bf16 %v62_v44, %v59_v41 }
   0xd   :  { %729 = vmatpush1.bf16.msra.mxu0 %v728_v19  ;;  %v58_v49 = vld [vmem:[%s1402_s1 + $0xf0] sm:$0xff]  ;;  %v794_v50 = vpack.c.bf16 %v45_v47, %v42_v46  ;;  %v61_v54 = vld [vmem:[%s1402_s1 + $0x108] sm:$0xff]  ;;  %v796_v55 = vpack.c.bf16 %v99_v52, %v96_v51  ;;  %v48_v56 = vld [vmem:[%s1402_s1 + $0xa0] sm:$0xff] }
   0xe   :  { %731 = vmatprep.subr.bf16.mxu0 %v730_v23  ;;  %791 = vmatpush3.bf16.msra.mxu1 %v790_v39  ;;  %v51_v57 = vld [vmem:[%s1402_s1 + $0xb8] sm:$0xff]  ;;  %v65_v58 = vld [vmem:[%s1402_s1 + $0x128] sm:$0xff]  ;;  %v68_v59 = vld [vmem:[%s1402_s1 + $0x140] sm:$0xff]  ;;  %v740_v62 = vpack.c.bf16 %v61_v54, %v58_v49 }
   0xf   :  { %793 = vmatprep.subr.bf16.mxu1 %v792_v45  ;;  %v102_v60 = vld [vmem:[%s1402_s1 + $0x250] sm:$0xff]  ;;  %v105_v61 = vld [vmem:[%s1402_s1 + $0x268] sm:$0xff]  ;;  %v64_v63 = vld [vmem:[%s1402_s1 + $0x120] sm:$0xff]  ;;  %v798_v1 = vpack.c.bf16 %v51_v57, %v48_v56  ;;  %v742_v2 = vpack.c.bf16 %v68_v59, %v65_v58 }
  0x10   :  { %v67_v0 = vld [vmem:[%s1402_s1 + $0x138] sm:$0xff]  ;;  %v800_v4 = vpack.c.bf16 %v105_v61, %v102_v60  ;;  %v54_v5 = vld [vmem:[%s1402_s1 + $0xd0] sm:$0xff]  ;;  %v57_v6 = vld [vmem:[%s1402_s1 + $0xe8] sm:$0xff] }
  0x11   :  { %733 = vmatpush1.bf16.msra.mxu0 %v732_v35  ;;  %v71_v3 = vld [vmem:[%s1402_s1 + $0x158] sm:$0xff]  ;;  %v74_v7 = vld [vmem:[%s1402_s1 + $0x170] sm:$0xff]  ;;  %v108_v8 = vld [vmem:[%s1402_s1 + $0x280] sm:$0xff]  ;;  %v744_v10 = vpack.c.bf16 %v67_v0, %v64_v63  ;;  %v802_v13 = vpack.c.bf16 %v57_v6, %v54_v5 }
  0x12   :  { %735 = vmatprep.subr.bf16.mxu0 %v734_v40  ;;  %795 = vmatpush3.bf16.msra.mxu1 %v794_v50  ;;  %v111_v9 = vld [vmem:[%s1402_s1 + $0x298] sm:$0xff]  ;;  %v70_v11 = vld [vmem:[%s1402_s1 + $0x150] sm:$0xff]  ;;  %v73_v12 = vld [vmem:[%s1402_s1 + $0x168] sm:$0xff]  ;;  %v746_v14 = vpack.c.bf16 %v74_v7, %v71_v3 }
  0x13   :  { %797 = vmatprep.subr.bf16.mxu1 %v796_v55  ;;  %v77_v15 = vld [vmem:[%s1402_s1 + $0x188] sm:$0xff]  ;;  %v804_v16 = vpack.c.bf16 %v111_v9, %v108_v8  ;;  %v60_v17 = vld [vmem:[%s1402_s1 + $0x100] sm:$0xff]  ;;  %v63_v18 = vld [vmem:[%s1402_s1 + $0x118] sm:$0xff]  ;;  %v748_v22 = vpack.c.bf16 %v73_v12, %v70_v11 }
  0x14   :  { %v80_v19 = vld [vmem:[%s1402_s1 + $0x1a0] sm:$0xff]  ;;  %v114_v20 = vld [vmem:[%s1402_s1 + $0x2b0] sm:$0xff]  ;;  %v117_v21 = vld [vmem:[%s1402_s1 + $0x2c8] sm:$0xff]  ;;  %v806_v26 = vpack.c.bf16 %v63_v18, %v60_v17 }
  0x15   :  { %737 = vmatpush1.bf16.msra.mxu0 %v736_v48  ;;  %v76_v23 = vld [vmem:[%s1402_s1 + $0x180] sm:$0xff]  ;;  %v79_v24 = vld [vmem:[%s1402_s1 + $0x198] sm:$0xff]  ;;  %v750_v27 = vpack.c.bf16 %v80_v19, %v77_v15  ;;  %v808_v28 = vpack.c.bf16 %v117_v21, %v114_v20  ;;  %v66_v29 = vld [vmem:[%s1402_s1 + $0x130] sm:$0xff] }
  0x16   :  { %739 = vmatprep.subr.bf16.mxu0 %v738_v53  ;;  %799 = vmatpush3.bf16.msra.mxu1 %v798_v1  ;;  %v83_v25 = vld [vmem:[%s1402_s1 + $0x1b8] sm:$0xff]  ;;  %v69_v30 = vld [vmem:[%s1402_s1 + $0x148] sm:$0xff]  ;;  %v86_v32 = vld [vmem:[%s1402_s1 + $0x1d0] sm:$0xff]  ;;  %v752_v35 = vpack.c.bf16 %v79_v24, %v76_v23 }
  0x17   :  { %801 = vmatprep.subr.bf16.mxu1 %v800_v4  ;;  %v25_v31 = vld [vmem:[%s1401_s0 + $0x8] sm:$0xff]  ;;  %v120_v33 = vld [vmem:[%s1402_s1 + $0x2e0] sm:$0xff]  ;;  %v123_v34 = vld [vmem:[%s1402_s1 + $0x2f8] sm:$0x3]  ;;  %v810_v38 = vpack.c.bf16 %v69_v30, %v66_v29  ;;  %v754_v39 = vpack.c.bf16 %v86_v32, %v83_v25 }
  0x18   :  { %618 = vmatprep.mubr.msk.f32.mxu1 %vm124_vm0, %v25_v31  ;;  %615 = vmatprep.mubr.msk.f32.mxu0 %vm124_vm0, %v25_v31  ;;  %v82_v36 = vld [vmem:[%s1402_s1 + $0x1b0] sm:$0xff]  ;;  %v85_v37 = vld [vmem:[%s1402_s1 + $0x1c8] sm:$0xff]  ;;  %vm1144_vm3 = vmpackc.low %vm131_vm1, %vm888_vm2  ;;  %v812_v41 = vpack.c.bf16 %v123_v34, %v120_v33 }
  0x19   :  { %741 = vmatpush1.bf16.msra.mxu0 %v740_v62  ;;  %v72_v42 = vld [vmem:[%s1402_s1 + $0x160] sm:$0xff]  ;;  %v75_v43 = vld [vmem:[%s1402_s1 + $0x178] sm:$0xff]  ;;  %v89_v44 = vld [vmem:[%s1402_s1 + $0x1e8] sm:$0xff] }
  0x1a   :  { %743 = vmatprep.subr.bf16.mxu0 %v742_v2  ;;  %803 = vmatpush3.bf16.msra.mxu1 %v802_v13  ;;  %v92_v45 = vld [vmem:[%s1402_s1 + $0x200] sm:$0xff] }
  0x1b   :  { %805 = vmatprep.subr.bf16.mxu1 %v804_v16 }
  0x1d   :  { %745 = vmatpush1.bf16.msra.mxu0 %v744_v10 }
  0x1e   :  { %747 = vmatprep.subr.bf16.mxu0 %v746_v14  ;;  %807 = vmatpush3.bf16.msra.mxu1 %v806_v26 }
  0x1f   :  { %809 = vmatprep.subr.bf16.mxu1 %v808_v28 }
  0x21   :  { %749 = vmatpush1.bf16.msra.mxu0 %v748_v22 }
  0x22   :  { %751 = vmatprep.subr.bf16.mxu0 %v750_v27 }
  0x23   :  { %11 = vsyncpa [#allocation3], 0  ;;  %v756_v46 = vpack.c.bf16 %v85_v37, %v82_v36  ;;  %811 = vmatpush3.bf16.msra.mxu1 %v810_v38  ;;  %v815_v47 = vpack.c.bf16 %v75_v43, %v72_v42  ;;  %v758_v48 = vpack.c.bf16 %v92_v45, %v89_v44  ;;  %v88_v49 = vld [vmem:[%s1402_s1 + $0x1e0] sm:$0xff]  ;;  %v91_v50 = vld [vmem:[%s1402_s1 + $0x1f8] sm:$0xff]  ;;  %vm453_vm4 = vcmask 1043456   ;;  %s892_s29 = smov [#allocation2]  }
  0x24   :  { %814 = vmatprep.subr.msk.bf16.mxu1 %vm1144_vm3, %v812_v41  ;;  %v95_v51 = vld [vmem:[%s1402_s1 + $0x218] sm:$0xff]  ;;  %v98_v52 = vld [vmem:[%s1402_s1 + $0x230] sm:$0xff]  ;;  %v760_v53 = vpack.c.bf16 %v91_v50, %v88_v49  ;;  %v24_v54 = vld [vmem:[%s1401_s0] sm:$0xff]  ;;  %vm890_vm6 = vmmov 0   ;;  %vm335_vm8 = vcmask 359424   ;;  %vm443_vm11 = vcmask 1041409  }
  0x25   :  { %753 = vmatpush1.bf16.msra.mxu0 %v752_v35  ;;  %v762_v55 = vpack.c.bf16 %v98_v52, %v95_v51  ;;  %v94_v56 = vld [vmem:[%s1402_s1 + $0x210] sm:$0xff]  ;;  %v97_v57 = vld [vmem:[%s1402_s1 + $0x228] sm:$0xff]  ;;  %v27_v58 = vld [vmem:[%s1401_s0 + $0x18] sm:$0xff]  ;;  %s605_s30 = sshll.u32 %s892_s29, 4  ;;  %vm597_vm12 = vcmask 9216   ;;  %s606_s30 = int_to_ptr.vmem [resolvable:$true] %s605_s30 }
  0x26   :  { %755 = vmatprep.subr.bf16.mxu0 %v754_v39  ;;  %v101_v59 = vld [vmem:[%s1402_s1 + $0x248] sm:$0xff]  ;;  %v104_v60 = vld [vmem:[%s1402_s1 + $0x260] sm:$0xff]  ;;  %v764_v61 = vpack.c.bf16 %v97_v57, %v94_v56  ;;  %v26_v62 = vld [vmem:[%s1401_s0 + $0x10] sm:$0xff]  ;;  %s864_s7 = scalar_lea.vmem %s606_s30, 32  ;;  %p869_p1 = scmp.lt.s32.totalorder %s606_s30, %s606_s30 }
  0x27   :  { %816 = vmatpush3.bf16.msra.mxu1 %v815_v47  ;;  %v766_v63 = vpack.c.bf16 %v104_v60, %v101_v59  ;;  %v100_v0 = vld [vmem:[%s1402_s1 + $0x240] sm:$0xff]  ;;  %v103_v1 = vld [vmem:[%s1402_s1 + $0x258] sm:$0xff]  ;;  %v110_v3 = vld [vmem:[%s1402_s1 + $0x290] sm:$0xff]  ;;  %p865_p0 = scmp.ne.s32.totalorder %s606_s30, %s864_s7  ;;  %p870_p2 = scmp.lt.s32.totalorder %s864_s7, %s864_s7 }
  0x28   :  { %v107_v2 = vld [vmem:[%s1402_s1 + $0x278] sm:$0xff]  ;;  %v768_v4 = vpack.c.bf16 %v103_v1, %v100_v0  ;;  %v106_v6 = vld [vmem:[%s1402_s1 + $0x270] sm:$0xff]  ;;  %v109_v7 = vld [vmem:[%s1402_s1 + $0x288] sm:$0xff] }
  0x29   :  { %757 = vmatpush1.bf16.msra.mxu0 %v756_v46  ;;  %v770_v5 = vpack.c.bf16 %v110_v3, %v107_v2  ;;  %v113_v8 = vld [vmem:[%s1402_s1 + $0x2a8] sm:$0xff]  ;;  %v116_v9 = vld [vmem:[%s1402_s1 + $0x2c0] sm:$0xff]  ;;  %v772_v10 = vpack.c.bf16 %v109_v7, %v106_v6  ;;  %v115_v13 = vld [vmem:[%s1402_s1 + $0x2b8] sm:$0xff]  ;;  %v889_v46 = vmov 0.0|0.0   ;;  %p871_p3 = por %p870_p2, %p869_p1 }
  0x2a   :  { %759 = vmatprep.subr.bf16.mxu0 %v758_v48  ;;  %283 = vmatmul.mubr.f32.vlgmr.msra.gmra.mrb[0].mxu1 %v24_v54  ;;  %v774_v11 = vpack.c.bf16 %v116_v9, %v113_v8  ;;  %v112_v12 = vld [vmem:[%s1402_s1 + $0x2a0] sm:$0xff]  ;;  %v119_v14 = vld [vmem:[%s1402_s1 + $0x2d8] sm:$0xff]  ;;  %v122_v15 = vld [vmem:[%s1402_s1 + $0x2f0] sm:$0x3] }
  0x2b   :  { %619 = vmatprep.mubr.msk.f32.mxu1 %vm124_vm0, %v27_v58  ;;  %v776_v16 = vpack.c.bf16 %v115_v13, %v112_v12  ;;  %v778_v17 = vpack.c.bf16 %v122_v15, %v119_v14  ;;  %v118_v18 = vld [vmem:[%s1402_s1 + $0x2d0] sm:$0xff]  ;;  %v121_v19 = vld [vmem:[%s1402_s1 + $0x2e8] sm:$0x3]  ;;  %v407_v21 = vld [vmem:[%s1405_s4 + $0x80] sm:$0xff]  ;;  %p872_p4 = pnand %p871_p3, %p865_p0 }
  0x2c   :  { %v781_v20 = vpack.c.bf16 %v121_v19, %v118_v18  ;;  %v408_v22 = vld [vmem:[%s1405_s4 + $0x88] sm:$0xff]  ;;  %v391_v24 = vld [vmem:[%s1405_s4] sm:$0xff]  ;;  %v409_v27 = vld [vmem:[%s1405_s4 + $0x90] sm:$0xff] }
  0x2d   :  { %761 = vmatpush1.bf16.msra.mxu0 %v760_v53  ;;  %v817_v23 = vpack.c.bf16 %v408_v22, %v407_v21  ;;  %v392_v25 = vld [vmem:[%s1405_s4 + $0x8] sm:$0xff]  ;;  %v410_v28 = vld [vmem:[%s1405_s4 + $0x98] sm:$0xff]  ;;  %v393_v30 = vld [vmem:[%s1405_s4 + $0x10] sm:$0xff] }
  0x2e   :  { %763 = vmatprep.subr.bf16.mxu0 %v762_v55  ;;  %288 = vmatmul.mubr.f32.gmra.mrb[2].mxu1 %v26_v62  ;;  %v819_v26 = vpack.c.bf16 %v392_v25, %v391_v24  ;;  %v821_v29 = vpack.c.bf16 %v410_v28, %v409_v27  ;;  %v394_v31 = vld [vmem:[%s1405_s4 + $0x18] sm:$0xff]  ;;  %v411_v33 = vld [vmem:[%s1405_s4 + $0xa0] sm:$0xff]  ;;  %v412_v34 = vld [vmem:[%s1405_s4 + $0xa8] sm:$0xff] }
  0x2f   :  { %818 = vmatprep.subr.bf16.mxu1 %v817_v23  ;;  %v823_v32 = vpack.c.bf16 %v394_v31, %v393_v30  ;;  %v825_v35 = vpack.c.bf16 %v412_v34, %v411_v33  ;;  %v395_v36 = vld [vmem:[%s1405_s4 + $0x20] sm:$0xff]  ;;  %v396_v37 = vld [vmem:[%s1405_s4 + $0x28] sm:$0xff]  ;;  %v413_v39 = vld [vmem:[%s1405_s4 + $0xb0] sm:$0xff] }
  0x30   :  { %820 = vmatpush3.bf16.msra.mxu1 %v819_v26  ;;  %v827_v38 = vpack.c.bf16 %v396_v37, %v395_v36  ;;  %v414_v40 = vld [vmem:[%s1405_s4 + $0xb8] sm:$0xff]  ;;  %v423_v41 = vld [vmem:[%s1405_s4 + $0x100] sm:$0xff]  ;;  %v424_v43 = vld [vmem:[%s1405_s4 + $0x108] sm:$0xff] }
  0x31   :  { %765 = vmatpush1.bf16.msra.mxu0 %v764_v61  ;;  %822 = vmatprep.subr.bf16.mxu1 %v821_v29  ;;  %v829_v42 = vpack.c.bf16 %v414_v40, %v413_v39  ;;  %v397_v44 = vld [vmem:[%s1405_s4 + $0x30] sm:$0xff]  ;;  %v398_v45 = vld [vmem:[%s1405_s4 + $0x38] sm:$0xff]  ;;  %v850_v47 = vpack.c.bf16 %v424_v43, %v423_v41  ;;  %v415_v49 = vld [vmem:[%s1405_s4 + $0xc0] sm:$0xff] }
  0x32   :  { %767 = vmatprep.subr.bf16.mxu0 %v766_v63  ;;  %v831_v48 = vpack.c.bf16 %v398_v45, %v397_v44  ;;  %v416_v50 = vld [vmem:[%s1405_s4 + $0xc8] sm:$0xff]  ;;  %v425_v51 = vld [vmem:[%s1405_s4 + $0x110] sm:$0xff]  ;;  %v426_v53 = vld [vmem:[%s1405_s4 + $0x118] sm:$0xff] }
  0x33   :  { %v833_v52 = vpack.c.bf16 %v416_v50, %v415_v49  ;;  %v400_v55 = vld [vmem:[%s1405_s4 + $0x48] sm:$0xff]  ;;  %v853_v56 = vpack.c.bf16 %v426_v53, %v425_v51  ;;  %vm857_vm5 = vmpackc.low %vm453_vm4, %vm888_vm2  ;;  %v418_v59 = vld [vmem:[%s1405_s4 + $0xd8] sm:$0xff] }
  0x34   :  { %824 = vmatpush3.bf16.msra.mxu1 %v823_v32  ;;  %v427_v60 = vld [vmem:[%s1405_s4 + $0x120] sm:$0xff]  ;;  %v401_v63 = vld [vmem:[%s1405_s4 + $0x50] sm:$0xff]  ;;  %v402_v0 = vld [vmem:[%s1405_s4 + $0x58] sm:$0xff] }
  0x35   :  { %769 = vmatpush1.bf16.msra.mxu0 %v768_v4  ;;  %826 = vmatprep.subr.bf16.mxu1 %v825_v35  ;;  %v839_v2 = vpack.c.bf16 %v402_v0, %v401_v63  ;;  %v419_v3 = vld [vmem:[%s1405_s4 + $0xe0] sm:$0xff]  ;;  %v420_v4 = vld [vmem:[%s1405_s4 + $0xe8] sm:$0xff]  ;;  %v405_v13 = vld [vmem:[%s1405_s4 + $0x70] sm:$0xff] }
  0x36   :  { %771 = vmatprep.subr.bf16.mxu0 %v770_v5  ;;  %v891_v5 = vmov 0.0   ;;  %v841_v6 = vpack.c.bf16 %v420_v4, %v419_v3  ;;  %v403_v7 = vld [vmem:[%s1405_s4 + $0x60] sm:$0xff]  ;;  %v404_v8 = vld [vmem:[%s1405_s4 + $0x68] sm:$0xff]  ;;  %v406_v14 = vld [vmem:[%s1405_s4 + $0x78] sm:$0xff] }
  0x37   :  { %v843_v9 = vpack.c.bf16 %v404_v8, %v403_v7  ;;  %v847_v15 = vpack.c.bf16 %v406_v14, %v405_v13  ;;  %v295_v19 = vld [vmem:[%s1403_s2] sm:$0x7] }
  0x38   :  { %828 = vmatpush3.bf16.msra.mxu1 %v827_v38  ;;  %v362_v40 = vld [vmem:[%s1404_s3] sm:$0x7] }
  0x39   :  { %773 = vmatpush1.bf16.msra.mxu0 %v772_v10  ;;  %830 = vmatprep.subr.bf16.mxu1 %v829_v42  ;;  %v421_v10 = vld [vmem:[%s1405_s4 + $0xf0] sm:$0xff] }
  0x3a   :  { %775 = vmatprep.subr.bf16.mxu0 %v774_v11  ;;  %v422_v11 = vld [vmem:[%s1405_s4 + $0xf8] sm:$0xff] }
  0x3b   :  { %v845_v12 = vpack.c.bf16 %v422_v11, %v421_v10 }
  0x3c   :  { %832 = vmatpush3.bf16.msra.mxu1 %v831_v48 }
  0x3d   :  { %777 = vmatpush1.bf16.msra.mxu0 %v776_v16  ;;  %834 = vmatprep.subr.bf16.mxu1 %v833_v52  ;;  %v293_v16 = vlaneseq }
  0x3e   :  { %780 = vmatprep.subr.msk.bf16.mxu0 %vm1144_vm3, %v778_v17 }
  0x3f   :  { %v1358_v17 = vshrl.u32 %v293_v16, 7 }
  0x41   :  { %783 = vmatpush1.bf16.msk.msra.mxu0 %vm1144_vm3, %v781_v20  ;;  %v306_v18 = vsub.s32 2, %v1358_v17  ;;  %v298_v39 = vsub.s32 0, %v1358_v17  ;;  %v302_v41 = vsub.s32 1, %v1358_v17 }
  0x42   :  { %849 = vmatprep.subr.bf16.mxu0 %v889_v46 }
  0x43   :  { %v307_v20 = vrot.slane %v295_v19, %v306_v18  ;;  %v375_v44 = vrot.slane %v362_v40, %v306_v18 }
  0x44   :  { %206 = vmatmul.mubr.f32.vlgmr.msra.gmra.mrb[0].mxu0 %v24_v54  ;;  %v399_v54 = vld [vmem:[%s1405_s4 + $0x40] sm:$0xff] }
  0x45   :  { %616 = vmatprep.mubr.msk.f32.mxu0 %vm124_vm0, %v27_v58  ;;  %851 = vmatpush3.bf16.msra.mxu0 %v850_v47  ;;  %v835_v57 = vpack.c.bf16 %v400_v55, %v399_v54  ;;  %v417_v58 = vld [vmem:[%s1405_s4 + $0xd0] sm:$0xff]  ;;  %vm310_vm7 = vcmp.lt.s32.totalorder %v1358_v17, %v307_v20  ;;  %v303_v47 = vrot.slane %v295_v19, %v302_v41 }
  0x46   :  { %852 = vmatprep.subr.bf16.mxu0 %v889_v46  ;;  %v837_v61 = vpack.c.bf16 %v418_v59, %v417_v58 }
  0x47   :  { %836 = vmatpush3.bf16.msra.mxu1 %v835_v57  ;;  %vm309_vm10 = vcmp.lt.s32.totalorder %v1358_v17, %v303_v47 }
  0x48   :  { %212 = vmatmul.mubr.f32.gmra.mrb[2].mxu0 %v26_v62  ;;  %v428_v62 = vld [vmem:[%s1405_s4 + $0x128] sm:$0xf]  ;;  %838 = vmatprep.subr.bf16.mxu1 %v837_v61 }
  0x49   :  { %854 = vmatpush3.bf16.msra.mxu0 %v853_v56  ;;  %v856_v1 = vpack.c.bf16 %v428_v62, %v427_v60  ;;  %715 = vmatprep.mubr.msk.f32.mxu0 %vm890_vm6, %v891_v5 }
  0x4a   :  { %855 = vmatprep.subr.bf16.mxu0 %v889_v46  ;;  %v299_v46 = vrot.slane %v295_v19, %v298_v39  ;;  %v367_v19 = vrot.slane %v362_v40, %v298_v39 }
  0x4b   :  { %840 = vmatpush3.bf16.msra.mxu1 %v839_v2 }
  0x4c   :  { %842 = vmatprep.subr.bf16.mxu1 %v841_v6  ;;  %vm308_vm9 = vcmp.lt.s32.totalorder %v1358_v17, %v299_v46 }
  0x4d   :  { %858 = vmatpush3.bf16.msk.msra.mxu0 %vm857_vm5, %v856_v1 }
  0x4f   :  { %844 = vmatpush3.bf16.msra.mxu1 %v843_v9 }
  0x50   :  { %846 = vmatprep.subr.bf16.mxu1 %v845_v12 }
  0x53   :  { %848 = vmatpush3.bf16.msra.mxu1 %v847_v15 }
  0xfd   :  { %v655_v21 = vpop.f32.mrb[0].mxu1 }
  0xfe   :  { %v656_v22 = vpop.f32.mrb[1].mxu1 }
  0xff   :  { %v657_v23 = vadd.f32 %v656_v22, %v655_v21  ;;  %v371_v22 = vrot.slane %v362_v40, %v302_v41  ;;  %v620_v40 = vld [vmem:[%s1406_s5] ss:$0 sm:$0xff] }
 0x101   :  { %v319_v24 = vsel %vm310_vm7, %v657_v23, -1e+30  ;;  %v658_v25 = vpop.f32.mrb[2].mxu1 }
 0x102   :  { %v336_v26 = vsel %vm335_vm8, %v319_v24, -inf  ;;  %v659_v27 = vpop.f32.mrb[3].mxu1 }
 0x103   :  { %v337_v28 = vrot.slane %v336_v26, 4  ;;  %v660_v29 = vadd.f32 %v659_v27, %v658_v25 }
 0x105   :  { %v338_v30 = vmax.f32 %v336_v26, %v337_v28  ;;  %v322_v31 = vsel %vm310_vm7, %v660_v29, -1e+30 }
 0x106   :  { %v355_v32 = vsel %vm335_vm8, %v322_v31, -inf }
 0x107   :  { %v339_v33 = vrot.slane %v338_v30, 2  ;;  %v356_v34 = vrot.slane %v355_v32, 4 }
 0x109   :  { %v340_v35 = vmax.f32 %v338_v30, %v339_v33  ;;  %v357_v36 = vmax.f32 %v355_v32, %v356_v34 }
 0x10b   :  { %v341_v37 = vrot.slane %v340_v35, 1  ;;  %v358_v38 = vrot.slane %v357_v36, 2 }
 0x10d   :  { %v342_v42 = vmax.f32 %v340_v35, %v341_v37  ;;  %v359_v43 = vmax.f32 %v357_v36, %v358_v38 }
 0x10f   :  { %v360_v45 = vrot.slane %v359_v43, 1  ;;  %v381_v48 = vadd.f32 %v375_v44, %v342_v42 }
 0x111   :  { %v361_v49 = vmax.f32 %v359_v43, %v360_v45  ;;  %v387_v51 = vmax.f32 %v381_v48, 0.0 }
 0x113   :  { %v384_v50 = vadd.f32 %v375_v44, %v361_v49 }
 0x115   :  { %v390_v52 = vmax.f32 %v384_v50, 0.0 }
 0x117   :  { %v207_v53 = vpop.f32.mrb[0].mxu0  ;;  %v447_v56 = vrot.slane %v390_v52, 7 }
 0x118   :  { %v317_v54 = vsel %vm308_vm9, %v207_v53, -1e+30  ;;  %v209_v55 = vpop.f32.mrb[1].mxu0 }
 0x119   :  { %v323_v57 = vrot.slane %v317_v54, 4  ;;  %v318_v58 = vsel %vm309_vm10, %v209_v55, -1e+30  ;;  %v448_v62 = vsel %vm443_vm11, %v447_v56, %v387_v51 }
 0x11a   :  { %v329_v59 = vrot.slane %v318_v58, 4  ;;  %716 = vmatmul.mubr.msk.f32.vlgmr.msra.gmra.mrb[4].mxu0 %vm335_vm8, %v448_v62 }
 0x11b   :  { %v324_v60 = vmax.f32 %v317_v54, %v323_v57  ;;  %v213_v61 = vpop.f32.mrb[2].mxu0 }
 0x11c   :  { %v330_v63 = vmax.f32 %v318_v58, %v329_v59  ;;  %v320_v0 = vsel %vm308_vm9, %v213_v61, -1e+30  ;;  %v215_v1 = vpop.f32.mrb[3].mxu0 }
 0x11d   :  { %v325_v2 = vrot.slane %v324_v60, 2  ;;  %v343_v3 = vrot.slane %v320_v0, 4  ;;  %v321_v4 = vsel %vm309_vm10, %v215_v1, -1e+30 }
 0x11e   :  { %v331_v5 = vrot.slane %v330_v63, 2  ;;  %v349_v6 = vrot.slane %v321_v4, 4 }
 0x11f   :  { %v326_v7 = vmax.f32 %v324_v60, %v325_v2  ;;  %v344_v8 = vmax.f32 %v320_v0, %v343_v3 }
 0x120   :  { %v332_v9 = vmax.f32 %v330_v63, %v331_v5  ;;  %v350_v10 = vmax.f32 %v321_v4, %v349_v6 }
 0x121   :  { %v327_v11 = vrot.slane %v326_v7, 1  ;;  %v345_v12 = vrot.slane %v344_v8, 2 }
 0x122   :  { %v333_v13 = vrot.slane %v332_v9, 1  ;;  %v351_v14 = vrot.slane %v350_v10, 2 }
 0x123   :  { %v346_v15 = vmax.f32 %v344_v8, %v345_v12  ;;  %v328_v18 = vmax.f32 %v326_v7, %v327_v11 }
 0x124   :  { %v352_v16 = vmax.f32 %v350_v10, %v351_v14  ;;  %v334_v21 = vmax.f32 %v332_v9, %v333_v13 }
 0x125   :  { %v347_v20 = vrot.slane %v346_v15, 1  ;;  %v379_v25 = vadd.f32 %v367_v19, %v328_v18 }
 0x126   :  { %v353_v23 = vrot.slane %v352_v16, 1  ;;  %v380_v27 = vadd.f32 %v371_v22, %v334_v21 }
 0x127   :  { %v348_v17 = vmax.f32 %v346_v15, %v347_v20  ;;  %v385_v31 = vmax.f32 %v379_v25, 0.0 }
 0x128   :  { %v354_v24 = vmax.f32 %v352_v16, %v353_v23  ;;  %v386_v33 = vmax.f32 %v380_v27, 0.0 }
 0x129   :  { %v382_v26 = vadd.f32 %v367_v19, %v348_v17 }
 0x12a   :  { %v383_v28 = vadd.f32 %v371_v22, %v354_v24 }
 0x12b   :  { %v388_v29 = vmax.f32 %v382_v26, 0.0 }
 0x12c   :  { %v389_v30 = vmax.f32 %v383_v28, 0.0 }
 0x12d   :  { %v442_v32 = vrot.slane %v388_v29, 7 }
 0x12e   :  { %v445_v34 = vrot.slane %v389_v30, 7 }
 0x12f   :  { %v444_v35 = vsel %vm443_vm11, %v442_v32, %v385_v31 }
 0x130   :  { %v446_v36 = vsel %vm443_vm11, %v445_v34, %v386_v33 }
 0x131   :  { %521 = vmatprep.mubr.f32.mxu1 %v446_v36 }
 0x132   :  { %522 = vmatmul.mubr.f32.vlgmr.msra.gmra.mrb[4].mxu1 %v444_v35 }
 0x1ed   :  { %v593_v37 = vpop.f32.mrb[4].mxu0 }
 0x1ee   :  { %v717_v38 = vpop.f32.mrb[5].mxu0 }
 0x205   :  { %v693_v39 = vpop.f32.mrb[4].mxu1 }
 0x206   :  { %v694_v41 = vpop.f32.mrb[5].mxu1 }
 0x207   :  { %v695_v42 = vadd.f32 %v694_v41, %v693_v39 }
 0x209   :  { %v524_v43 = vadd.f32 %v695_v42, %v620_v40 }
 0x20b   :  { %v594_v44 = vadd.f32 %v593_v37, %v524_v43 }
 0x20d   :  { %598 = vst.msk [vmem:[#allocation2] sm:$0x3] %vm597_vm12, %v594_v44 }
 0x20e   :  { %875 = shalt.err (!%p872_p4)
}
 0x20f   :  { %s876_s5 = scalar_lea.hbm %s1407_s6, 32 }
 0x210   :  { %p877_p5 = scmp.ne.s32.totalorder %s1407_s6, %s876_s5  ;;  %p880_p6 = scmp.lt.u32.totalorder %s876_s5, %s1407_s6 }
 0x212   :  { %p882_p7 = pnand %p880_p6, %p877_p5 }
 0x214   :  { %885 = shalt.err (!%p882_p7)
}
 0x215   :  { %608 = dma.vmem_to_hbm [thread:$0]  %s606_s30, 32, %s1407_s6, [#allocation3]  }
 0x216   :  { %886 = dma.done.wait [#allocation3], 32  }
 0x217   :  { %887 = vsyncadd [#allocation3], 4294967264 }
 0x218   :  { %612 = vsyncpa [#allocation3], 1 }

</bundles_post_ra>
